<compile_context>
chip_gen: v5e
topology: v5e:2x2
jax: 0.10.0
libtpu: 0.0.40
codegen_flags: <defaults>
</compile_context>

<pallas_src>
import functools

import jax
import jax.numpy as jnp
from jax.experimental import pallas as pl
from jax.experimental.pallas import tpu as pltpu


def _round_up(x, m):
    return ((x + m - 1) // m) * m


def _ma_kernel(x_ref, a_ref, res_ref, mean_ref, *, inv_k):
    """mean = (x @ A_counts) * (1/k) on the MXU; res = x - mean on the VPU."""
    x = x_ref[...]
    a = a_ref[...]
    if x.dtype == a.dtype:
        x_mm, a_mm = x, a                     # native-rate MXU path (f32/bf16)
    else:
        x_mm, a_mm = x.astype(jnp.float32), a.astype(jnp.float32)
    acc = jnp.dot(x_mm, a_mm, preferred_element_type=jnp.float32)
    mean = acc * inv_k
    res_ref[...] = (x.astype(jnp.float32) - mean).astype(res_ref.dtype)
    mean_ref[...] = mean.astype(mean_ref.dtype)


def _build_count_matrix(length, kernel_size, padding_mode="last", pad_length=5):
    """(L, L) matrix A with moving_mean = (x @ A) / kernel_size."""
    k = kernel_size
    p = (k - 1) // 2
    j = jnp.arange(length)
    a = jnp.zeros((length, length), dtype=jnp.float32)
    one = jnp.ones((length,), dtype=jnp.float32)

    if padding_mode == "last":
        for d in range(-p, p + 1):
            src = jnp.clip(j + d, 0, length - 1)
            a = a.at[src, j].add(one)
    elif padding_mode == "mean":
        pad_n = min(pad_length, length)
        for d in range(-p, p + 1):
            t = j + d
            in_range = (t >= 0) & (t <= length - 1)
            src = jnp.clip(t, 0, length - 1)
            a = a.at[src, j].add(jnp.where(in_range, 1.0, 0.0).astype(jnp.float32))
            front_w = jnp.where(t < 0, 1.0 / pad_n, 0.0).astype(jnp.float32)
            end_w = jnp.where(t > length - 1, 1.0 / pad_n, 0.0).astype(jnp.float32)
            for s in range(pad_n):
                a = a.at[s, j].add(front_w)
            for s in range(length - pad_n, length):
                a = a.at[s, j].add(end_w)
    else:
        # TODO(synk): padding_mode='median' is data-dependent (non-linear); it
        # cannot be folded into a constant averaging matrix.
        raise NotImplementedError("padding_mode='median' not supported")
    return a


def _vmem_budget_bytes():
    try:
        cap = int(pltpu.get_tpu_info().vmem_capacity_bytes)
    except Exception:
        cap = 64 * 1024 * 1024
    return int(cap * 0.75)   # leave headroom for Mosaic internal scratch


def moving_average_decomposition(x, kernel_size, stride=1, padding_mode="last"):
    """Pallas equivalent of the PyTorch module forward: returns (res, mean)."""
    assert stride == 1, "module semantics only shape-consistent for stride=1"
    assert kernel_size % 2 == 1, "odd kernel_size required (as in the module)"

    orig_shape = x.shape
    length = orig_shape[-1]
    m = 1
    for d in orig_shape[:-1]:
        m *= d
    x2d = x.reshape(m, length)          # leading-dim collapse only (no HBM pass)

    # Exact 0/1.. integer band; bf16 storage is lossless for 'last' counts.
    a_dtype = x.dtype if (x.dtype == jnp.bfloat16 and padding_mode == "last") else jnp.float32
    a_mat = _build_count_matrix(length, kernel_size, padding_mode).astype(a_dtype)

    in_bytes = jnp.dtype(x.dtype).itemsize
    out_bytes = in_bytes
    a_bytes = jnp.dtype(a_dtype).itemsize

    vmem_budget = _vmem_budget_bytes()

    # Row tile choice: as large as VMEM allows (<=512), multiple of 8, but keep
    # at least 2 grid steps when m permits so both v7x TensorCores are used.
    if m <= 8:
        tm = m
    else:
        avail = vmem_budget - length * length * a_bytes
        per_row = length * (2 * in_bytes + 4 * out_bytes)
        tm_cap = max(8, (avail // max(per_row, 1)) // 8 * 8) if avail > 0 else 8
        tm_two = _round_up(pl.cdiv(m, 2), 8)
        tm = max(8, min(512, int(tm_cap), tm_two, _round_up(m, 8)))
    n_row_tiles = pl.cdiv(m, tm)

    resident = (length * length * a_bytes                 # A (single-buffered)
                + 2 * tm * length * in_bytes              # x tile (double-buffered)
                + 2 * 2 * tm * length * out_bytes)        # res+mean tiles
    vmem_limit = min(max(int(resident * 1.5), 16 * 1024 * 1024), vmem_budget)

    cost = pl.CostEstimate(
        flops=2 * m * length * length + 3 * m * length,
        transcendentals=0,
        bytes_accessed=m * length * (in_bytes + 2 * out_bytes) + length * length * a_bytes,
    )

    kernel = functools.partial(_ma_kernel, inv_k=1.0 / float(kernel_size))

    # A is invariant across the grid -> single VMEM buffer is enough.
    try:
        a_spec = pl.BlockSpec((length, length), lambda i: (0, 0),
                              pipeline_mode=pl.Buffered(1))
    except TypeError:  # older BlockSpec signature without pipeline_mode
        a_spec = pl.BlockSpec((length, length), lambda i: (0, 0))

    res, mean = pl.pallas_call(
        kernel,
        out_shape=(
            jax.ShapeDtypeStruct((m, length), x.dtype),
            jax.ShapeDtypeStruct((m, length), x.dtype),
        ),
        grid_spec=pltpu.PrefetchScalarGridSpec(
            num_scalar_prefetch=0,
            grid=(n_row_tiles,),
            in_specs=[
                pl.BlockSpec((tm, length), lambda i: (i, 0)),   # x row tile
                a_spec,                                         # count matrix
            ],
            out_specs=[
                pl.BlockSpec((tm, length), lambda i: (i, 0)),   # res
                pl.BlockSpec((tm, length), lambda i: (i, 0)),   # moving_mean
            ],
        ),
        compiler_params=pltpu.CompilerParams(
            dimension_semantics=("parallel",),
            vmem_limit_bytes=vmem_limit,
        ),
        cost_estimate=cost,
    )(x2d, a_mat)

    return res.reshape(orig_shape), mean.reshape(orig_shape)


def _reference(x, kernel_size, padding_mode="last"):
    """Pure-JAX reference matching the PyTorch module semantics."""
    p = (kernel_size - 1) // 2
    if padding_mode == "last":
        front = jnp.repeat(x[..., :1], p, axis=-1)
        end = jnp.repeat(x[..., -1:], p, axis=-1)
    elif padding_mode == "mean":
        front = jnp.repeat(jnp.mean(x[..., :5], axis=-1, keepdims=True), p, axis=-1)
        end = jnp.repeat(jnp.mean(x[..., -5:], axis=-1, keepdims=True), p, axis=-1)
    else:
        raise NotImplementedError(padding_mode)
    xp = jnp.concatenate([front, x, end], axis=-1)
    L = x.shape[-1]
    windows = jnp.stack([xp[..., i:i + L] for i in range(kernel_size)], axis=0)
    mean = jnp.mean(windows, axis=0)
    return x - mean, mean


if __name__ == "__main__":
    key = jax.random.PRNGKey(0)
    k1, k2 = jax.random.split(key)
    kernel_size = 25

    # Case 1: typical small shape (batch=2, channels=4, seq_len=128).
    x1 = jax.random.normal(k1, (2, 4, 128), dtype=jnp.float32)
    res1, mean1 = moving_average_decomposition(x1, kernel_size=kernel_size)
    res1 = jax.block_until_ready(res1)
    mean1 = jax.block_until_ready(mean1)
    r1_ref, m1_ref = _reference(x1, kernel_size)
    assert res1.shape == x1.shape and mean1.shape == x1.shape
    assert jnp.allclose(mean1, m1_ref, atol=1e-4, rtol=1e-4), (
        float(jnp.max(jnp.abs(mean1 - m1_ref))))
    assert jnp.allclose(res1, r1_ref, atol=1e-4, rtol=1e-4), (
        float(jnp.max(jnp.abs(res1 - r1_ref))))

    # Case 2: rows not a multiple of the row tile (exercises the masked edge tile).
    x2 = jax.random.normal(k2, (3, 5, 128), dtype=jnp.float32)
    res2, mean2 = moving_average_decomposition(x2, kernel_size=kernel_size)
    res2 = jax.block_until_ready(res2)
    mean2 = jax.block_until_ready(mean2)
    r2_ref, m2_ref = _reference(x2, kernel_size)
    assert jnp.allclose(mean2, m2_ref, atol=1e-4, rtol=1e-4), (
        float(jnp.max(jnp.abs(mean2 - m2_ref))))
    assert jnp.allclose(res2, r2_ref, atol=1e-4, rtol=1e-4), (
        float(jnp.max(jnp.abs(res2 - r2_ref))))

    print("KERNEL_OK")
</pallas_src>

<mosaic_0001>
module attributes {stable_mosaic.version = 11 : i64} {
  func.func @_ma_kernel(%arg0: i32, %arg1: memref<8x128xf32, #tpu.memory_space<vmem>>, %arg2: memref<128x128xf32, #tpu.memory_space<vmem>>, %arg3: memref<8x128xf32, #tpu.memory_space<vmem>>, %arg4: memref<8x128xf32, #tpu.memory_space<vmem>>) attributes {dimension_semantics = [#tpu.dimension_semantics<parallel>], iteration_bounds = array<i64: 1>, scalar_prefetch = 0 : i64, scratch_operands = 0 : i64, tpu.core_type = #tpu.core_type<tc>, window_params = [{transform_indices = @transform_0, window_bounds = array<i64: 8, 128>}, {pipeline_mode = #tpu.pipeline_mode<synchronous>, transform_indices = @transform_1, window_bounds = array<i64: 128, 128>}, {transform_indices = @transform_2, window_bounds = array<i64: 8, 128>}, {transform_indices = @transform_3, window_bounds = array<i64: 8, 128>}]} {
    %c0 = arith.constant 0 : index
    %c0_0 = arith.constant 0 : index
    %0 = vector.load %arg1[%c0, %c0_0] : memref<8x128xf32, #tpu.memory_space<vmem>>, vector<8x128xf32>
    %c0_1 = arith.constant 0 : index
    %c0_2 = arith.constant 0 : index
    %1 = vector.load %arg2[%c0_1, %c0_2] : memref<128x128xf32, #tpu.memory_space<vmem>>, vector<128x128xf32>
    %cst = arith.constant dense<0.000000e+00> : vector<8x128xf32>
    %2 = tpu.matmul %0, %1, %cst {dimension_numbers = #tpu.dot_dimension_numbers<[1], [0], [0], [1], [0, 0, 1, 1], [], []>} : vector<8x128xf32>, vector<128x128xf32>, vector<8x128xf32> -> vector<8x128xf32>
    %cst_3 = arith.constant 4.000000e-02 : f32
    %3 = vector.broadcast %cst_3 : f32 to vector<8x128xf32>
    %4 = arith.mulf %2, %3 : vector<8x128xf32>
    %5 = arith.subf %0, %4 : vector<8x128xf32>
    %c0_4 = arith.constant 0 : index
    %c0_5 = arith.constant 0 : index
    %6 = vector.load %arg3[%c0_4, %c0_5] : memref<8x128xf32, #tpu.memory_space<vmem>>, vector<8x128xf32>
    tpu.vector_store %arg3[%c0_4, %c0_5], %5 {strides = array<i32>} : memref<8x128xf32, #tpu.memory_space<vmem>>, vector<8x128xf32>,
    %c0_6 = arith.constant 0 : index
    %c0_7 = arith.constant 0 : index
    %7 = vector.load %arg4[%c0_6, %c0_7] : memref<8x128xf32, #tpu.memory_space<vmem>>, vector<8x128xf32>
    tpu.vector_store %arg4[%c0_6, %c0_7], %4 {strides = array<i32>} : memref<8x128xf32, #tpu.memory_space<vmem>>, vector<8x128xf32>,
    return
  }
  func.func @transform_0(%arg0: i32) -> (i32, i32) {
    %c0_i32 = arith.constant 0 : i32
    %c0_i32_0 = arith.constant 0 : i32
    return %arg0, %c0_i32 : i32, i32
  }
  func.func @transform_1(%arg0: i32) -> (i32, i32) {
    %c0_i32 = arith.constant 0 : i32
    %c0_i32_0 = arith.constant 0 : i32
    %c0_i32_1 = arith.constant 0 : i32
    return %c0_i32, %c0_i32_0 : i32, i32
  }
  func.func @transform_2(%arg0: i32) -> (i32, i32) {
    %c0_i32 = arith.constant 0 : i32
    %c0_i32_0 = arith.constant 0 : i32
    return %arg0, %c0_i32 : i32, i32
  }
  func.func @transform_3(%arg0: i32) -> (i32, i32) {
    %c0_i32 = arith.constant 0 : i32
    %c0_i32_0 = arith.constant 0 : i32
    return %arg0, %c0_i32 : i32, i32
  }
}

</mosaic_0001>

<bundles_post_ra>
// kernel: tpu_custom_call.1
= control target key start
LH: loop header
LB: loop body
LE: loop exit
PB: predicated region body
PF: predicated region fallthrough
CT: control target
= control target key end

     0   :  { %9 = vsyncpa [#allocation3], 0  ;;  %s268_s0 = inlined_call_operand.hbm [shape: f32[8,128], index: 0, kind: input, shape index: {}]   ;;  %s269_s1 = inlined_call_operand.hbm [shape: f32[128,128], index: 1, kind: input, shape index: {}]   ;;  %s270_s2 = inlined_call_operand.hbm [shape: f32[8,128], index: 2, kind: output, shape index: {0}]   ;;  %s271_s3 = inlined_call_operand.hbm [shape: f32[8,128], index: 3, kind: output, shape index: {1}]  }
   0x1   :  { %10 = vsyncpa [#allocation6], 0 }
   0x2   :  { %11 = vsyncpa [#allocation4], 0 }
   0x3   :  { %12 = vsyncpa [#allocation9], 0  ;;  %s18_s14 = sshll.u32 %s268_s0, 4  ;;  %s230_s15 = smov [#allocation2]   ;;  %s19_s14 = int_to_ptr.hbm [resolvable:$true] %s18_s14 }
   0x4   :  { %s20_s16 = sshll.u32 %s230_s15, 4  ;;  %s28_s19 = sshll.u32 %s269_s1, 4  ;;  %s21_s16 = int_to_ptr.vmem [resolvable:$true] %s20_s16  ;;  %s29_s19 = int_to_ptr.hbm [resolvable:$true] %s28_s19 }
   0x5   :  { %23 = dma.hbm_to_vmem [thread:$0]  %s19_s14, 128, %s21_s16, [#allocation3]  }
   0x6   :  { %s231_s20 = smov [#allocation5]   ;;  %s232_s22 = smov 128  }
   0x7   :  { %s30_s21 = sshll.u32 %s231_s20, 4  ;;  %s233_s23 = smov 8   ;;  %s31_s21 = int_to_ptr.vmem [resolvable:$true] %s30_s21 }
   0x8   :  { %36 = dma.hbm_to_vmem [thread:$0]  %s29_s19, 2048, %s31_s21, [#allocation6], %s232_s22, %s232_s22, %s233_s23  }
   0x9   :  { %222 = dma.done.wait [#allocation3], 128  }
   0xa   :  { %223 = vsyncadd [#allocation3], 4294967168 }
   0xb   :  { %224 = dma.done.wait [#allocation6], 2048  }
   0xc   :  { %225 = vsyncadd [#allocation6], 4294965248  ;;  %v61_v0 = vld [vmem:[#allocation5 + $0x78] sm:$0xff]  ;;  %v60_v1 = vld [vmem:[#allocation5 + $0x70] sm:$0xff]  ;;  %s234_s0 = smov [#allocation8]   ;;  %s104_s26 = sshll.u32 %s271_s3, 4  ;;  %s105_s26 = int_to_ptr.hbm [resolvable:$true] %s104_s26 }
   0xd   :  { %62 = vmatpush.msra.mxu0 %v61_v0  ;;  %v59_v2 = vld [vmem:[#allocation5 + $0x68] sm:$0xff]  ;;  %v58_v3 = vld [vmem:[#allocation5 + $0x60] sm:$0xff]  ;;  %v57_v4 = vld [vmem:[#allocation5 + $0x58] sm:$0xff]  ;;  %s102_s1 = sshll.u32 %s234_s0, 4  ;;  %s235_s27 = smov [#allocation7]   ;;  %s103_s1 = int_to_ptr.vmem [resolvable:$true] %s102_s1 }
   0xe   :  { %v56_v5 = vld [vmem:[#allocation5 + $0x50] sm:$0xff]  ;;  %v55_v6 = vld [vmem:[#allocation5 + $0x48] sm:$0xff]  ;;  %v54_v7 = vld [vmem:[#allocation5 + $0x40] sm:$0xff]  ;;  %s91_s28 = sshll.u32 %s235_s27, 4  ;;  %s93_s4 = sshll.u32 %s270_s2, 4  ;;  %s92_s28 = int_to_ptr.vmem [resolvable:$true] %s91_s28  ;;  %s94_s4 = int_to_ptr.hbm [resolvable:$true] %s93_s4 }
   0xf   :  { %63 = vmatpush.msra.mxu0 %v60_v1  ;;  %v53_v8 = vld [vmem:[#allocation5 + $0x38] sm:$0xff]  ;;  %v52_v9 = vld [vmem:[#allocation5 + $0x30] sm:$0xff]  ;;  %v51_v10 = vld [vmem:[#allocation5 + $0x28] sm:$0xff] }
  0x10   :  { %v50_v11 = vld [vmem:[#allocation5 + $0x20] sm:$0xff]  ;;  %v49_v12 = vld [vmem:[#allocation5 + $0x18] sm:$0xff]  ;;  %v48_v13 = vld [vmem:[#allocation5 + $0x10] sm:$0xff] }
  0x11   :  { %64 = vmatpush.msra.mxu0 %v59_v2  ;;  %v47_v14 = vld [vmem:[#allocation5 + $0x8] sm:$0xff]  ;;  %v46_v15 = vld [vmem:[#allocation5] sm:$0xff]  ;;  %v45_v16 = vld [vmem:[#allocation2] sm:$0xff] }
  0x13   :  { %65 = vmatpush.msra.mxu0 %v58_v3 }
  0x15   :  { %66 = vmatpush.msra.mxu0 %v57_v4 }
  0x17   :  { %67 = vmatpush.msra.mxu0 %v56_v5 }
  0x19   :  { %68 = vmatpush.msra.mxu0 %v55_v6 }
  0x1b   :  { %69 = vmatpush.msra.mxu0 %v54_v7 }
  0x1d   :  { %70 = vmatpush.msra.mxu0 %v53_v8 }
  0x1f   :  { %71 = vmatpush.msra.mxu0 %v52_v9 }
  0x21   :  { %72 = vmatpush.msra.mxu0 %v51_v10 }
  0x23   :  { %73 = vmatpush.msra.mxu0 %v50_v11 }
  0x25   :  { %74 = vmatpush.msra.mxu0 %v49_v12 }
  0x27   :  { %75 = vmatpush.msra.mxu0 %v48_v13 }
  0x29   :  { %76 = vmatpush.msra.mxu0 %v47_v14 }
  0x2b   :  { %77 = vmatpush.msra.mxu0 %v46_v15 }
  0x2c   :  { %78 = vmatmul.f32.vlgmr.msra.gmra.mxu0 %v45_v16 }
  0xa9   :  { %v79_v17 = vpop.f32.mrf.mxu0 }
  0xaa   :  { %v82_v18 = vmul.f32 0.04, %v79_v17 }
  0xac   :  { %v83_v19 = vsub.f32 %v45_v16, %v82_v18  ;;  %85 = vst [vmem:[#allocation8] sm:$0xff] %v82_v18 }
  0xad   :  { %107 = dma.vmem_to_hbm [thread:$0]  %s103_s1, 128, %s105_s26, [#allocation9]  }
  0xae   :  { %84 = vst [vmem:[#allocation7] sm:$0xff] %v83_v19 }
  0xaf   :  { %96 = dma.vmem_to_hbm [thread:$0]  %s92_s28, 128, %s94_s4, [#allocation4]  }
  0xb0   :  { %226 = dma.done.wait [#allocation4], 128  }
  0xb1   :  { %227 = vsyncadd [#allocation4], 4294967168 }
  0xb2   :  { %228 = dma.done.wait [#allocation9], 128  }
  0xb3   :  { %229 = vsyncadd [#allocation9], 4294967168 }
  0xb4   :  { %116 = vsyncpa [#allocation3], 1 }
  0xb5   :  { %117 = vsyncpa [#allocation6], 1 }
  0xb6   :  { %118 = vsyncpa [#allocation4], 1 }
  0xb7   :  { %119 = vsyncpa [#allocation9], 1 }

</bundles_post_ra>
